<compile_context>
chip_gen: v6e
topology: v6e:2x2x1
jax: 0.10.0
libtpu: 0.0.40
codegen_flags: <defaults>
</compile_context>

<pallas_src>
import functools

import numpy as np
import jax
import jax.numpy as jnp
from jax.experimental import pallas as pl
from jax.experimental.pallas import tpu as pltpu


# --------------------------------------------------------------------------
# kernels
# --------------------------------------------------------------------------
def _channel_attention(x, w1t_ref, b1_ref, w2t_ref, b2_ref, B):
    """Channel-attention gate. x: (B, C, HW) f32 -> x * sigmoid(MLP(avg)+MLP(max))."""
    avg_c = jnp.mean(x, axis=2)                               # (B, C)  lane reduce
    max_c = jnp.max(x, axis=2)                                # (B, C)
    v = jnp.concatenate([avg_c, max_c], axis=0)               # (2B, C) fused MLP input
    h = jnp.dot(v.astype(jnp.bfloat16), w1t_ref[...],
                preferred_element_type=jnp.float32) + b1_ref[...]   # (2B, Cr)
    h = jnp.maximum(h, 0.0)                                          # ReLU
    z = jnp.dot(h.astype(jnp.bfloat16), w2t_ref[...],
                preferred_element_type=jnp.float32) + b2_ref[...]   # (2B, C)
    chan = jax.nn.sigmoid(z[:B] + z[B:])                      # (B, C)
    return x * chan[:, :, None]                               # (B, C, HW)


def cbam_kernel_matmul(x_ref, w1t_ref, b1_ref, w2t_ref, b2_ref,
                       cma_ref, cmm_ref, bc_ref, o_ref, *, B):
    """Small feature maps: 7x7 spatial conv as two lane-dense MXU matmuls.

    x_ref  : (B, C, HW)  VMEM (lane-dense: HW % 128 == 0)
    cma_ref: (HW, HW)    VMEM bf16 (conv matrix, avg channel)
    cmm_ref: (HW, HW)    VMEM bf16 (conv matrix, max channel)
    bc_ref : (1,)        SMEM (spatial conv bias)
    """
    x = x_ref[...].astype(jnp.float32)
    xc = _channel_attention(x, w1t_ref, b1_ref, w2t_ref, b2_ref, B)

    s_avg = jnp.mean(xc, axis=1)                              # (B, HW) sublane reduce
    s_max = jnp.max(xc, axis=1)                               # (B, HW)
    conv = (jnp.dot(s_avg.astype(jnp.bfloat16), cma_ref[...],
                    preferred_element_type=jnp.float32)
            + jnp.dot(s_max.astype(jnp.bfloat16), cmm_ref[...],
                      preferred_element_type=jnp.float32)
            + bc_ref[0])                                      # (B, HW)
    spat = jax.nn.sigmoid(conv)
    o_ref[...] = (xc * spat[:, None, :]).astype(o_ref.dtype)


def cbam_kernel_roll(x_ref, w1t_ref, b1_ref, w2t_ref, b2_ref,
                     mask_ref, wc_ref, bc_ref, o_ref, *, B, H, W, K):
    """Large feature maps: 7x7 spatial conv as 49 taps via pltpu.roll (O(HW)).

    mask_ref: (K*K, HW) VMEM f32 precomputed edge-validity masks per tap
    wc_ref  : (2*K*K,)  SMEM f32 conv weights (avg taps then max taps)
    """
    HW = H * W
    P = K // 2
    x = x_ref[...].astype(jnp.float32)
    xc = _channel_attention(x, w1t_ref, b1_ref, w2t_ref, b2_ref, B)

    s_avg = jnp.mean(xc, axis=1)                              # (B, HW)
    s_max = jnp.max(xc, axis=1)                               # (B, HW)
    conv = jnp.zeros(s_avg.shape, jnp.float32)
    for kh in range(K):                                       # 49 static taps
        for kw in range(K):
            t = kh * K + kw
            shift = (-((kh - P) * W + (kw - P))) % HW
            sa = pltpu.roll(s_avg, shift, 1) if shift else s_avg
            sm = pltpu.roll(s_max, shift, 1) if shift else s_max
            m = mask_ref[pl.ds(t, 1), :]                      # (1, HW) edge mask
            conv = conv + m * (wc_ref[t] * sa + wc_ref[K * K + t] * sm)
    spat = jax.nn.sigmoid(conv + bc_ref[0])
    o_ref[...] = (xc * spat[:, None, :]).astype(o_ref.dtype)


# --------------------------------------------------------------------------
# wrapper-side preprocessing (pure weight/layout work, no compute hoisted)
# --------------------------------------------------------------------------
def _build_conv_matrix(wc, H, W, K):
    """Conv2d(2, 1, K, padding=K//2) as a (2*HW, HW) matmul matrix."""
    P = K // 2
    HW = H * W
    c, kh, kw, i, j = np.meshgrid(np.arange(2), np.arange(K), np.arange(K),
                                  np.arange(H), np.arange(W), indexing="ij")
    ii = i + kh - P
    jj = j + kw - P
    valid = (ii >= 0) & (ii < H) & (jj >= 0) & (jj < W)
    rows = (c * HW + ii * W + jj)[valid]
    cols = (i * W + j)[valid]
    taps = (c * K * K + kh * K + kw)[valid]
    wflat = wc.reshape(-1).astype(jnp.float32)                # (2*K*K,)
    return jnp.zeros((2 * HW, HW), jnp.float32).at[rows, cols].set(wflat[taps])


def _build_tap_masks(H, W, K):
    """Per-tap validity masks for the roll formulation: (K*K, HW) f32."""
    P = K // 2
    HW = H * W
    p = np.arange(HW)
    i = p // W
    j = p % W
    masks = np.zeros((K * K, HW), np.float32)
    for kh in range(K):
        for kw in range(K):
            valid = ((i + kh - P >= 0) & (i + kh - P < H) &
                     (j + kw - P >= 0) & (j + kw - P < W))
            masks[kh * K + kw] = valid.astype(np.float32)
    return jnp.asarray(masks)


def _pick_batch_tile(N, C, HW, itemsize, target_bytes=2 << 20, min_steps=4):
    """Largest divisor of N giving >= min_steps grid steps (best effort) while
    keeping the per-step x tile <= target_bytes (cheap double-buffering)."""
    per_image = C * HW * itemsize
    divisors = [d for d in range(1, N + 1) if N % d == 0]
    cands = [d for d in divisors if N // d >= min(min_steps, N)] or divisors
    fit = [d for d in cands if d * per_image <= target_bytes] or [cands[0]]
    return max(fit)


def cbam_forward(x, params, *, K=7, batch_tile=None, spatial_mode=None):
    """CBAM forward. x: (N, C, H, W). spatial_mode: None (auto) | 'matmul' | 'roll'."""
    N, C, H, W = x.shape
    HW = H * W
    Cr = params["w1"].shape[0]
    assert HW % 128 == 0, "H*W must be a multiple of 128 for lane-dense tiles"
    # TODO(synk): pad HW to the next lane multiple (with masked mean/max) so
    # non-128-multiple feature maps (7x7, 14x14, 56x56) are supported.
    itemsize = jnp.dtype(x.dtype).itemsize
    B = batch_tile if batch_tile is not None else _pick_batch_tile(N, C, HW, itemsize)
    assert N % B == 0, "batch tile must divide batch size"
    if spatial_mode is None:
        # dense conv-as-matmul is O(HW^2); use the 49-tap roll form beyond 32x32
        spatial_mode = "matmul" if HW <= 1024 else "roll"

    x2 = x.reshape(N, C, HW)                                   # free HBM reshape
    w1t = params["w1"].T.astype(jnp.bfloat16)                  # (C, Cr)
    b1 = params["b1"].reshape(1, Cr).astype(jnp.float32)
    w2t = params["w2"].T.astype(jnp.bfloat16)                  # (Cr, C)
    b2 = params["b2"].reshape(1, C).astype(jnp.float32)
    bc = params["bc"].reshape(1).astype(jnp.float32)           # SMEM scalar

    def const_spec(shape):                                     # grid-invariant input
        return pl.BlockSpec(shape, lambda n: (0,) * len(shape),
                            pipeline_mode=pl.Buffered(1))      # single-buffered

    smem_spec = pl.BlockSpec(memory_space=pltpu.MemorySpace.SMEM)

    if spatial_mode == "matmul":
        cm = _build_conv_matrix(params["wc"], H, W, K)         # (2*HW, HW) f32
        cm_avg = cm[:HW].astype(jnp.bfloat16)
        cm_max = cm[HW:].astype(jnp.bfloat16)
        kernel = functools.partial(cbam_kernel_matmul, B=B)
        extra_args = (cm_avg, cm_max, bc)
        extra_specs = [const_spec((HW, HW)), const_spec((HW, HW)), smem_spec]
        spatial_flops = 4 * HW * HW
    elif spatial_mode == "roll":
        masks = _build_tap_masks(H, W, K)                      # (K*K, HW) f32
        wc = params["wc"].reshape(2 * K * K).astype(jnp.float32)
        kernel = functools.partial(cbam_kernel_roll, B=B, H=H, W=W, K=K)
        extra_args = (masks, wc, bc)
        extra_specs = [const_spec((K * K, HW)), smem_spec, smem_spec]
        spatial_flops = 6 * K * K * HW
    else:
        raise ValueError(f"unknown spatial_mode: {spatial_mode}")

    const_args = (w1t, b1, w2t, b2) + extra_args
    in_specs = [pl.BlockSpec((B, C, HW), lambda n: (n, 0, 0)),
                const_spec((C, Cr)), const_spec((1, Cr)),
                const_spec((Cr, C)), const_spec((1, C))] + extra_specs

    grid_spec = pltpu.PrefetchScalarGridSpec(
        num_scalar_prefetch=0,
        grid=(N // B,),
        in_specs=in_specs,
        out_specs=pl.BlockSpec((B, C, HW), lambda n: (n, 0, 0)),
    )

    const_bytes = sum(int(a.size) * jnp.dtype(a.dtype).itemsize for a in const_args)
    tile_bytes = B * C * HW * itemsize
    # double-buffered x-in/out tiles + single-buffered invariants + small scratch
    est_vmem = 4 * tile_bytes + const_bytes + 4 * B * HW * 4
    cp_kwargs = dict(dimension_semantics=("parallel",))        # independent batch tiles
    if est_vmem > 28 * (1 << 20):
        # Raise the scoped VMEM limit only when the footprint needs it (v5e/v6e
        # headroom); on v7x (64 MiB VMEM) prefer smaller B / the roll path.
        cp_kwargs["vmem_limit_bytes"] = int(min(2 * est_vmem, 100 * (1 << 20)))

    cost = pl.CostEstimate(
        flops=int(N * (8 * C * Cr + spatial_flops + 8 * C * HW)),
        transcendentals=int(N * (C + HW)),
        bytes_accessed=int(2 * N * C * HW * itemsize + const_bytes),
    )

    out = pl.pallas_call(
        kernel,
        out_shape=jax.ShapeDtypeStruct((N, C, HW), x.dtype),
        grid_spec=grid_spec,
        compiler_params=pltpu.CompilerParams(**cp_kwargs),
        cost_estimate=cost,
    )(x2, *const_args)

    return out.reshape(N, C, H, W)


# --------------------------------------------------------------------------
# parameters + pure-JAX reference
# --------------------------------------------------------------------------
def init_params(key, C, K=7):
    """Deterministic synthetic parameters (shapes match nn.Module __init__)."""
    Cr = C // 8
    ks = jax.random.split(key, 6)
    return dict(
        w1=0.2 * jax.random.normal(ks[0], (Cr, C), jnp.float32),      # Conv2d(C, C//8, 1)
        b1=0.1 * jax.random.normal(ks[1], (Cr,), jnp.float32),
        w2=0.2 * jax.random.normal(ks[2], (C, Cr), jnp.float32),      # Conv2d(C//8, C, 1)
        b2=0.1 * jax.random.normal(ks[3], (C,), jnp.float32),
        wc=0.2 * jax.random.normal(ks[4], (1, 2, K, K), jnp.float32), # Conv2d(2, 1, 7, pad=3)
        bc=0.1 * jax.random.normal(ks[5], (1,), jnp.float32),
    )


def cbam_ref(x, p):
    """Pure-JAX reference of the PyTorch forward pass (NCHW, f32)."""
    w1, b1, w2, b2 = p["w1"], p["b1"], p["w2"], p["b2"]

    def fc(v):                                   # v: (N, C)
        h = jnp.maximum(v @ w1.T + b1, 0.0)
        return h @ w2.T + b2

    avg = jnp.mean(x, axis=(2, 3))
    mx = jnp.max(x, axis=(2, 3))
    chan = jax.nn.sigmoid(fc(avg) + fc(mx))[:, :, None, None]
    xc = x * chan

    s_avg = jnp.mean(xc, axis=1, keepdims=True)
    s_max = jnp.max(xc, axis=1, keepdims=True)
    s = jnp.concatenate([s_avg, s_max], axis=1)
    conv = jax.lax.conv_general_dilated(
        s, p["wc"], window_strides=(1, 1), padding=((3, 3), (3, 3)),
        dimension_numbers=("NCHW", "OIHW", "NCHW"))
    spat = jax.nn.sigmoid(conv + p["bc"][None, :, None, None])
    return xc * spat


if __name__ == "__main__":
    key = jax.random.PRNGKey(0)
    kx, kp = jax.random.split(key)

    # in_channels must be >= 8 (Conv2d(C, C//8, 1)); HW=256 is lane-dense.
    # N=8 with the auto batch tile (B=2) gives grid=(4,): pipelined + even step
    # count so the "parallel" axis can shard across v7x's two TensorCores.
    N, C, H, W = 8, 16, 16, 16
    x = jax.random.normal(kx, (N, C, H, W), jnp.float32)
    params = init_params(kp, C)
    ref = cbam_ref(x, params)

    # Path 1: dense conv-as-matmul (auto-selected for HW <= 32x32).
    out = jax.block_until_ready(cbam_forward(x, params))
    assert out.shape == (N, C, H, W) and out.dtype == x.dtype
    # bf16 MXU operands (f32 accumulation) -> looser tolerance than pure f32.
    assert jnp.allclose(out, ref, atol=5e-2, rtol=5e-2), float(
        jnp.max(jnp.abs(out - ref)))

    # Path 2: 49-tap pltpu.roll formulation (auto-selected for HW > 32x32);
    # exercised here at the small size to validate it on-device as well.
    out_roll = jax.block_until_ready(
        cbam_forward(x, params, spatial_mode="roll"))
    assert jnp.allclose(out_roll, ref, atol=5e-2, rtol=5e-2), float(
        jnp.max(jnp.abs(out_roll - ref)))

    print("KERNEL_OK")
</pallas_src>

<mosaic_0001>
module attributes {stable_mosaic.version = 11 : i64} {
  func.func @cbam_kernel_matmul(%arg0: i32, %arg1: memref<2x16x256xf32, #tpu.memory_space<vmem>>, %arg2: memref<16x2xbf16, #tpu.memory_space<vmem>>, %arg3: memref<1x2xf32, #tpu.memory_space<vmem>>, %arg4: memref<2x16xbf16, #tpu.memory_space<vmem>>, %arg5: memref<1x16xf32, #tpu.memory_space<vmem>>, %arg6: memref<256x256xbf16, #tpu.memory_space<vmem>>, %arg7: memref<256x256xbf16, #tpu.memory_space<vmem>>, %arg8: memref<1xf32, #tpu.memory_space<smem>>, %arg9: memref<2x16x256xf32, #tpu.memory_space<vmem>>) attributes {dimension_semantics = [#tpu.dimension_semantics<parallel>], iteration_bounds = array<i64: 4>, scalar_prefetch = 0 : i64, scratch_operands = 0 : i64, tpu.core_type = #tpu.core_type<tc>, window_params = [{transform_indices = @transform_0, window_bounds = array<i64: 2, 16, 256>}, {pipeline_mode = #tpu.pipeline_mode<synchronous>, transform_indices = @transform_1, window_bounds = array<i64: 16, 2>}, {pipeline_mode = #tpu.pipeline_mode<synchronous>, transform_indices = @transform_2, window_bounds = array<i64: 1, 2>}, {pipeline_mode = #tpu.pipeline_mode<synchronous>, transform_indices = @transform_3, window_bounds = array<i64: 2, 16>}, {pipeline_mode = #tpu.pipeline_mode<synchronous>, transform_indices = @transform_4, window_bounds = array<i64: 1, 16>}, {pipeline_mode = #tpu.pipeline_mode<synchronous>, transform_indices = @transform_5, window_bounds = array<i64: 256, 256>}, {pipeline_mode = #tpu.pipeline_mode<synchronous>, transform_indices = @transform_6, window_bounds = array<i64: 256, 256>}, {transform_indices = @transform_7, window_bounds = array<i64: 1>}, {transform_indices = @transform_8, window_bounds = array<i64: 2, 16, 256>}]} {
    %c0 = arith.constant 0 : index
    %c0_0 = arith.constant 0 : index
    %c0_1 = arith.constant 0 : index
    %0 = vector.load %arg1[%c0, %c0_0, %c0_1] : memref<2x16x256xf32, #tpu.memory_space<vmem>>, vector<2x16x256xf32>
    %cst = arith.constant dense<0.000000e+00> : vector<2x16xf32>
    %1 = vector.multi_reduction <add>, %0, %cst [2] : vector<2x16x256xf32> to vector<2x16xf32>
    %cst_2 = arith.constant 2.560000e+02 : f32
    %2 = vector.broadcast %cst_2 : f32 to vector<2x16xf32>
    %3 = arith.divf %1, %2 : vector<2x16xf32>
    %cst_3 = arith.constant dense<0xFF800000> : vector<2x16xf32>
    %4 = vector.multi_reduction <maximumf>, %0, %cst_3 [2] : vector<2x16x256xf32> to vector<2x16xf32>
    %5 = tpu.concatenate %3, %4 in 0 : vector<2x16xf32>, vector<2x16xf32> -> vector<4x16xf32>
    %6 = arith.truncf %5 : vector<4x16xf32> to vector<4x16xbf16>
    %c0_4 = arith.constant 0 : index
    %c0_5 = arith.constant 0 : index
    %7 = vector.load %arg2[%c0_4, %c0_5] : memref<16x2xbf16, #tpu.memory_space<vmem>>, vector<16x2xbf16>
    %cst_6 = arith.constant dense<0.000000e+00> : vector<4x2xf32>
    %8 = tpu.matmul %6, %7, %cst_6 {dimension_numbers = #tpu.dot_dimension_numbers<[1], [0], [0], [1], [0, 0, 1, 1], [], []>} : vector<4x16xbf16>, vector<16x2xbf16>, vector<4x2xf32> -> vector<4x2xf32>
    %c0_7 = arith.constant 0 : index
    %c0_8 = arith.constant 0 : index
    %9 = vector.load %arg3[%c0_7, %c0_8] : memref<1x2xf32, #tpu.memory_space<vmem>>, vector<1x2xf32>
    %10 = vector.broadcast %9 : vector<1x2xf32> to vector<4x2xf32>
    %11 = arith.addf %8, %10 : vector<4x2xf32>
    %cst_9 = arith.constant 0.000000e+00 : f32
    %12 = vector.broadcast %cst_9 : f32 to vector<4x2xf32>
    %13 = arith.maximumf %11, %12 : vector<4x2xf32>
    %14 = arith.truncf %13 : vector<4x2xf32> to vector<4x2xbf16>
    %c0_10 = arith.constant 0 : index
    %c0_11 = arith.constant 0 : index
    %15 = vector.load %arg4[%c0_10, %c0_11] : memref<2x16xbf16, #tpu.memory_space<vmem>>, vector<2x16xbf16>
    %cst_12 = arith.constant dense<0.000000e+00> : vector<4x16xf32>
    %16 = tpu.matmul %14, %15, %cst_12 {dimension_numbers = #tpu.dot_dimension_numbers<[1], [0], [0], [1], [0, 0, 1, 1], [], []>} : vector<4x2xbf16>, vector<2x16xbf16>, vector<4x16xf32> -> vector<4x16xf32>
    %c0_13 = arith.constant 0 : index
    %c0_14 = arith.constant 0 : index
    %17 = vector.load %arg5[%c0_13, %c0_14] : memref<1x16xf32, #tpu.memory_space<vmem>>, vector<1x16xf32>
    %18 = vector.broadcast %17 : vector<1x16xf32> to vector<4x16xf32>
    %19 = arith.addf %16, %18 : vector<4x16xf32>
    %20 = vector.extract_strided_slice %19 {offsets = [0, 0], sizes = [2, 16], strides = [1, 1]} : vector<4x16xf32> to vector<2x16xf32>
    %21 = vector.extract_strided_slice %19 {offsets = [2, 0], sizes = [2, 16], strides = [1, 1]} : vector<4x16xf32> to vector<2x16xf32>
    %22 = arith.addf %20, %21 : vector<2x16xf32>
    %23 = arith.negf %22 : vector<2x16xf32>
    %24 = math.exp %23 : vector<2x16xf32>
    %cst_15 = arith.constant 1.000000e+00 : f32
    %25 = vector.broadcast %cst_15 : f32 to vector<2x16xf32>
    %26 = arith.addf %25, %24 : vector<2x16xf32>
    %27 = arith.divf %25, %26 : vector<2x16xf32>
    %28 = vector.shape_cast %27 : vector<2x16xf32> to vector<2x16x1xf32>
    %29 = vector.broadcast %28 : vector<2x16x1xf32> to vector<2x16x256xf32>
    %30 = arith.mulf %0, %29 : vector<2x16x256xf32>
    %cst_16 = arith.constant dense<0.000000e+00> : vector<2x256xf32>
    %31 = vector.multi_reduction <add>, %30, %cst_16 [1] : vector<2x16x256xf32> to vector<2x256xf32>
    %cst_17 = arith.constant 1.600000e+01 : f32
    %32 = vector.broadcast %cst_17 : f32 to vector<2x256xf32>
    %33 = arith.divf %31, %32 : vector<2x256xf32>
    %cst_18 = arith.constant dense<0xFF800000> : vector<2x256xf32>
    %34 = vector.multi_reduction <maximumf>, %30, %cst_18 [1] : vector<2x16x256xf32> to vector<2x256xf32>
    %35 = arith.truncf %33 : vector<2x256xf32> to vector<2x256xbf16>
    %c0_19 = arith.constant 0 : index
    %c0_20 = arith.constant 0 : index
    %36 = vector.load %arg6[%c0_19, %c0_20] : memref<256x256xbf16, #tpu.memory_space<vmem>>, vector<256x256xbf16>
    %cst_21 = arith.constant dense<0.000000e+00> : vector<2x256xf32>
    %37 = tpu.matmul %35, %36, %cst_21 {dimension_numbers = #tpu.dot_dimension_numbers<[1], [0], [0], [1], [0, 0, 1, 1], [], []>} : vector<2x256xbf16>, vector<256x256xbf16>, vector<2x256xf32> -> vector<2x256xf32>
    %38 = arith.truncf %34 : vector<2x256xf32> to vector<2x256xbf16>
    %c0_22 = arith.constant 0 : index
    %c0_23 = arith.constant 0 : index
    %39 = vector.load %arg7[%c0_22, %c0_23] : memref<256x256xbf16, #tpu.memory_space<vmem>>, vector<256x256xbf16>
    %cst_24 = arith.constant dense<0.000000e+00> : vector<2x256xf32>
    %40 = tpu.matmul %38, %39, %cst_24 {dimension_numbers = #tpu.dot_dimension_numbers<[1], [0], [0], [1], [0, 0, 1, 1], [], []>} : vector<2x256xbf16>, vector<256x256xbf16>, vector<2x256xf32> -> vector<2x256xf32>
    %41 = arith.addf %37, %40 : vector<2x256xf32>
    %c0_25 = arith.constant 0 : index
    %42 = memref.load %arg8[%c0_25] : memref<1xf32, #tpu.memory_space<smem>>
    %43 = vector.broadcast %42 : f32 to vector<2x256xf32>
    %44 = arith.addf %41, %43 : vector<2x256xf32>
    %45 = arith.negf %44 : vector<2x256xf32>
    %46 = math.exp %45 : vector<2x256xf32>
    %cst_26 = arith.constant 1.000000e+00 : f32
    %47 = vector.broadcast %cst_26 : f32 to vector<2x256xf32>
    %48 = arith.addf %47, %46 : vector<2x256xf32>
    %49 = arith.divf %47, %48 : vector<2x256xf32>
    %50 = vector.shape_cast %49 : vector<2x256xf32> to vector<2x1x256xf32>
    %51 = vector.broadcast %50 : vector<2x1x256xf32> to vector<2x16x256xf32>
    %52 = arith.mulf %30, %51 : vector<2x16x256xf32>
    %c0_27 = arith.constant 0 : index
    %c0_28 = arith.constant 0 : index
    %c0_29 = arith.constant 0 : index
    %53 = vector.load %arg9[%c0_27, %c0_28, %c0_29] : memref<2x16x256xf32, #tpu.memory_space<vmem>>, vector<2x16x256xf32>
    tpu.vector_store %arg9[%c0_27, %c0_28, %c0_29], %52 {strides = array<i32>} : memref<2x16x256xf32, #tpu.memory_space<vmem>>, vector<2x16x256xf32>,
    return
  }
  func.func @transform_0(%arg0: i32) -> (i32, i32, i32) {
    %c0_i32 = arith.constant 0 : i32
    %c0_i32_0 = arith.constant 0 : i32
    %c0_i32_1 = arith.constant 0 : i32
    return %arg0, %c0_i32, %c0_i32_0 : i32, i32, i32
  }
  func.func @transform_1(%arg0: i32) -> (i32, i32) {
    %c0_i32 = arith.constant 0 : i32
    %c0_i32_0 = arith.constant 0 : i32
    %c0_i32_1 = arith.constant 0 : i32
    return %c0_i32, %c0_i32_0 : i32, i32
  }
  func.func @transform_2(%arg0: i32) -> (i32, i32) {
    %c0_i32 = arith.constant 0 : i32
    %c0_i32_0 = arith.constant 0 : i32
    %c0_i32_1 = arith.constant 0 : i32
    return %c0_i32, %c0_i32_0 : i32, i32
  }
  func.func @transform_3(%arg0: i32) -> (i32, i32) {
    %c0_i32 = arith.constant 0 : i32
    %c0_i32_0 = arith.constant 0 : i32
    %c0_i32_1 = arith.constant 0 : i32
    return %c0_i32, %c0_i32_0 : i32, i32
  }
  func.func @transform_4(%arg0: i32) -> (i32, i32) {
    %c0_i32 = arith.constant 0 : i32
    %c0_i32_0 = arith.constant 0 : i32
    %c0_i32_1 = arith.constant 0 : i32
    return %c0_i32, %c0_i32_0 : i32, i32
  }
  func.func @transform_5(%arg0: i32) -> (i32, i32) {
    %c0_i32 = arith.constant 0 : i32
    %c0_i32_0 = arith.constant 0 : i32
    %c0_i32_1 = arith.constant 0 : i32
    return %c0_i32, %c0_i32_0 : i32, i32
  }
  func.func @transform_6(%arg0: i32) -> (i32, i32) {
    %c0_i32 = arith.constant 0 : i32
    %c0_i32_0 = arith.constant 0 : i32
    %c0_i32_1 = arith.constant 0 : i32
    return %c0_i32, %c0_i32_0 : i32, i32
  }
  func.func @transform_7(%arg0: i32) -> i32 {
    %c0_i32 = arith.constant 0 : i32
    %c0_i32_0 = arith.constant 0 : i32
    return %c0_i32 : i32
  }
  func.func @transform_8(%arg0: i32) -> (i32, i32, i32) {
    %c0_i32 = arith.constant 0 : i32
    %c0_i32_0 = arith.constant 0 : i32
    %c0_i32_1 = arith.constant 0 : i32
    return %arg0, %c0_i32, %c0_i32_0 : i32, i32, i32
  }
}

</mosaic_0001>

<bundles_post_ra>
// kernel: tpu_custom_call.1
= control target key start
LH: loop header
LB: loop body
LE: loop exit
PB: predicated region body
PF: predicated region fallthrough
CT: control target
= control target key end

     0   :  { %s2168_s0 = inlined_call_operand.hbm [shape: f32[8,16,256], index: 0, kind: input, shape index: {}]   ;;  %s2169_s1 = inlined_call_operand.vmem [shape: bf16[16,2], index: 1, kind: input, shape index: {}]   ;;  %s2170_s2 = inlined_call_operand.vmem [shape: f32[1,2], index: 2, kind: input, shape index: {}]   ;;  %s2171_s3 = inlined_call_operand.vmem [shape: bf16[2,16], index: 3, kind: input, shape index: {}]   ;;  %s2172_s4 = inlined_call_operand.vmem [shape: f32[1,16], index: 4, kind: input, shape index: {}]   ;;  %s2173_s5 = inlined_call_operand.hbm [shape: bf16[256,256], index: 5, kind: input, shape index: {}]   ;;  %s2174_s6 = inlined_call_operand.hbm [shape: bf16[256,256], index: 6, kind: input, shape index: {}]   ;;  %s2175_s7 = inlined_call_operand.<no memory space> [shape: f32[1], index: 7, kind: input, shape index: {}]   ;;  %s2176_s8 = inlined_call_operand.hbm [shape: f32[8,16,256], index: 8, kind: output, shape index: {}]  }
   0x1   :  { %2181 = sst [smem:[#allocation13_spill]] %s2173_s5 }
   0x2   :  { %13 = sst [smem:[#allocation2]] %s2175_s7 }
   0x3   :  { %14 = vsyncpa [#allocation4], 0 }
   0x4   :  { %16 = vsyncpa [#allocation4 + $0x1], 0 }
   0x5   :  { %17 = vsyncpa [#allocation7], 0 }
   0x6   :  { %18 = vsyncpa [#allocation5], 0 }
   0x7   :  { %20 = vsyncpa [#allocation5 + $0x1], 0  ;;  %s1864_s29 = smov 0   ;;  %s1866_s30 = smov 0  }
   0x8   :  { %s1868_s9 = smov 0   ;;  %s1870_s10 = smov 0  }
   0x9 LB: > { %s1885_s7 = sadd.s32 4294967295, %s1801_s10   ;;  %s1356_s11 = sadd.s32 4294967294, %s1801_s10   ;;  %s1801_s10 = sphi %s1870_s10, %s2199_s10   ;;  %s1797_s9 = sphi %s1868_s9, %s2198_s9   ;;  %s1793_s30 = sphi %s1866_s30, %s2197_s30   ;;  %s1789_s29 = sphi %s1864_s29, %s2196_s29  }
   0xa   : > { %p46_p0 = scmp.ne.s32.totalorder %s1793_s30, %s1789_s29  ;;  %p2177_p1 = scmp.eq.s32.totalorder %s1885_s7, 0 }
   0xb   : > { %p223_p3 = scmp.eq.s32.totalorder %s1356_s11, 3  ;;  %p1357_p5 = scmp.ge.s32.totalorder %s1801_s10, 1 }
   0xc   : > { %p1894_p4 = por %p2177_p1, %p46_p0  ;;  %p230_p7 = scmp.lt.s32.totalorder %s1801_s10, 5 }
   0xd   : > { %p1899_p6 = por %p223_p3, %p46_p0  ;;  %s1803_s15 = smov [#allocation6]  }
   0xe   : > { %s2182_s12 = scalar_select %p1894_p4, 1, 0 }
   0xf   : > { %s2183_s13 = scalar_select %p1899_p6, 1, 0 }
  0x10   : > { %p1904_p8 = pnand %p1357_p5, %p230_p7  ;;  %s254_s16 = sshll.u32 %s1803_s15, 4  ;;  %s255_s16 = int_to_ptr.vmem [resolvable:$true] %s254_s16 }
  0x11   : > { %s1804_s18 = smov [#allocation8]   ;;  %s1664_s20 = scalar_lea.vmem %s255_s16, 4096 }
  0x12   : > { %s2184_s14 = scalar_select %p1904_p8, 1, 0 }
  0x13   : > { %p1480_p9 = pneg %p1904_p8  ;;  %s267_s19 = sshll.u32 %s1804_s18, 4  ;;  %s268_s19 = int_to_ptr.vmem [resolvable:$true] %s267_s19 }
  0x14   : > { %p1665_p12 = scmp.ne.s32.totalorder %s255_s16, %s1664_s20  ;;  %p1672_p3 = scmp.lt.s32.totalorder %s255_s16, %s255_s16 }
  0x15   : > { %p1912_p10 = pnand %p1480_p9, %p2177_p1  ;;  %p1673_p5 = scmp.lt.s32.totalorder %s1664_s20, %s1664_s20 }
  0x17   : > { %p1655_p11 = pneg %p1912_p10  ;;  %p1674_p7 = por %p1673_p5, %p1672_p3 }
  0x19   : > { %p1667_p13 = pnand %p1665_p12, %p1655_p11 }
  0x1b   : > { %p1668_p0 = pneg %p1667_p13 }
  0x1d   : > { %p1675_p9 = pnand %p1674_p7, %p1668_p0 }
  0x1f   : > { %1678 = shalt.err (!%p1675_p9)
}
  0x20   : > { %s1805_s21 = smov 128   ;;  %s1806_s22 = smov 8  }
  0x21   : > { %s2186_s5 = sld [smem:[#allocation13_spill]]  ;;  %s1690_s25 = scalar_lea.vmem %s268_s19, 4096 }
  0x22   : > { %p1691_p1 = scmp.ne.s32.totalorder %s268_s19, %s1690_s25  ;;  %p1698_p2 = scmp.lt.s32.totalorder %s268_s19, %s268_s19 }
  0x23   : > { %p1699_p6 = scmp.lt.s32.totalorder %s1690_s25, %s1690_s25 }
  0x24   : > { %p1693_p12 = pnand %p1691_p1, %p1655_p11 }
  0x25   : > { %p1700_p3 = por %p1699_p6, %p1698_p2 }
  0x26   : > { %p1694_p13 = pneg %p1693_p12 }
  0x27   : > { %1483 = dma.hbm_to_vmem [thread:$0]  (!%p1912_p10), %s2186_s5, 4096, %s255_s16, [#allocation7], %s1805_s21, %s1805_s21, %s1806_s22  }
  0x28   : > { %p1701_p0 = pnand %p1700_p3, %p1694_p13 }
  0x2a   : > { %1704 = shalt.err (!%p1701_p0)
}
  0x2b   : > { %1486 = dma.hbm_to_vmem [thread:$0]  (!%p1912_p10), %s2174_s6, 4096, %s268_s19, [#allocation7], %s1805_s21, %s1805_s21, %s1806_s22  }
  0x2c   : > { %s1935_s28 = sadd.s32 1, %s1801_s10   ;;  %s33_s11 = sadd.s32 1, %s1797_s9 }
  0x2d   : > { %s30_s15 = ssub.s32 %s1801_s10, %s1935_s28  ;;  %p40_p1 = scmp.ne.s32.totalorder %s1797_s9, %s1793_s30 }
  0x2e   : > { %p31_p2 = scmp.eq.s32.totalorder %s30_s15, 0  ;;  %p41_p6 = scmp.eq.s32.totalorder %s1801_s10, 0 }
  0x2f   : > { %p2187_p11 = scmp.eq.s32.totalorder %s1885_s7, 3  ;;  %p1497_p7 = scmp.lt.s32.totalorder %s1801_s10, 4 }
  0x30   : > { %s1951_s17 = scalar_select %p31_p2, %s1797_s9, %s33_s11  }
  0x31   : > { %p1945_p5 = por %p2187_p11, %p40_p1  ;;  %p42_p9 = por %p41_p6, %p40_p1 }
  0x32   : > { %s284_s18 = sand.u32 1, %s1797_s9   ;;  %s1449_s19 = sshll.u32 %s1801_s10, 10 }
  0x33   : > { %s2188_s16 = scalar_select %p1945_p5, 1, 0 }
  0x34   : > { %s1361_s20 = sshll.u32 %s284_s18, 6  ;;  %s1958_s23 = scalar_lea.hbm %s2168_s0, %s1449_s19 }
  0x35   : > { %s288_s24 = scalar_lea.vmem [#allocation3], %s1361_s20  ;;  %p1962_p10 = pnand %p1497_p7, %p42_p9 }
  0x36   : > { %s296_s25 = sshll.u32 %s288_s24, 4  ;;  %s1966_s27 = scalar_lea.sflag [#allocation4], %s284_s18  ;;  %s1960_s25 = int_to_ptr.vmem [resolvable:$true] %s296_s25 }
  0x37   : > { %s1705_s11 = scalar_lea.hbm %s1958_s23, 1024  ;;  %p1707_p13 = pneg %p1962_p10 }
  0x38   : > { %p1706_p12 = scmp.ne.s32.totalorder %s1958_s23, %s1705_s11  ;;  %s1710_s20 = scalar_lea.hbm %s2168_s0, 4096 }
  0x39   : > { %p1711_p1 = scmp.lt.s32.totalorder %s1958_s23, %s2168_s0  ;;  %p1712_p2 = scmp.lt.s32.totalorder %s1710_s20, %s1705_s11 }
  0x3a   : > { %p1708_p3 = pnand %p1707_p13, %p1706_p12 }
  0x3b   : > { %p1713_p6 = por %p1712_p2, %p1711_p1 }
  0x3c   : > { %p1709_p0 = pneg %p1708_p3 }
  0x3e   : > { %p1714_p11 = pnand %p1713_p6, %p1709_p0 }
  0x40   : > { %1717 = shalt.err (!%p1714_p11)
}
  0x41   : > { %s1718_s18 = scalar_lea.vmem %s1960_s25, 1024  ;;  %s1807_s24 = smov [#allocation3]  }
  0x42   : > { %p1719_p7 = scmp.ne.s32.totalorder %s1960_s25, %s1718_s18  ;;  %s1723_s5 = sshll.u32 %s1807_s24, 4  ;;  %s1724_s5 = int_to_ptr.vmem [resolvable:$false] %s1723_s5 }
  0x43   : > { %s1725_s15 = scalar_lea.vmem %s1724_s5, 2048  ;;  %p1726_p3 = scmp.lt.s32.totalorder %s1960_s25, %s1724_s5 }
  0x44   : > { %p1721_p9 = pnand %p1719_p7, %p1707_p13  ;;  %p1727_p5 = scmp.lt.s32.totalorder %s1725_s15, %s1718_s18 }
  0x46   : > { %p1722_p12 = pneg %p1721_p9  ;;  %p1728_p4 = por %p1727_p5, %p1726_p3 }
  0x48   : > { %p1729_p8 = pnand %p1728_p4, %p1722_p12 }
  0x4a   : > { %1732 = shalt.err (!%p1729_p8)
}
  0x4b   : > { %s1808_s11 = smov 256   ;;  %s1809_s19 = smov 16  }
  0x4c   : > { %1490 = dma.hbm_to_vmem [thread:$0]  (!%p1962_p10), %s1958_s23, 1024, %s1960_s25, %s1966_s27, %s1808_s11, %s1808_s11, %s1809_s19  }
  0x4d   : > { %p2190_p13 = scmp.ne.s32.totalorder %s2184_s14, 0 }
  0x4e   : > { %s1990_s20 = sand.u32 (!%p2190_p13), 1, %s1793_s30   ;;  %p2191_p4 = scmp.ne.s32.totalorder (!%p2190_p13), %s2182_s12, 0 }
  0x4f   : > { %308 = sbr.rel (%p2190_p13) target bundleno = 1090 (0x442), region = 52  ;;  %s1366_s5 = sshll.u32 (!%p2190_p13), %s1990_s20, 6 }
  0x50   : > { %s311_s21 = scalar_lea.sflag (!%p2190_p13), [#allocation4], %s1990_s20  ;;  %s314_s22 = scalar_lea.vmem (!%p2190_p13), [#allocation3], %s1366_s5 }
  0x54   : > { %1776 = dma.done.wait (%p2191_p4), %s311_s21, 1024  }
  0x55   : > { %1778 = vsyncadd (%p2191_p4), %s311_s21, 4294966272  ;;  %p2192_p8 = scmp.eq.s32.totalorder %s1885_s7, 0 }
  0x57   : > { %1780 = dma.done.wait (%p2192_p8), [#allocation7], 8192   ;;  %p2193_p5 = pmov %p2192_p8 }
  0x58   : > { %v2004_v0 = vld [vmem:[%s314_s22 + $0x20] sm:$0xff]  ;;  %v2006_v1 = vld [vmem:[%s314_s22 + $0x28] sm:$0xff]  ;;  %v2014_v5 = vld [vmem:[%s314_s22 + $0x30] sm:$0xff]  ;;  %v1810_v17 = vmov 0.0   ;;  %vm1811_vm0 = vmmov 0   ;;  %v399_v18 = vlaneseq  ;;  %vm410_vm1 = vcmask 130112  }
  0x59   : > { %1782 = vsyncadd (%p2193_p5), [#allocation7], 4294959104  ;;  %v2008_v2 = vld [vmem:[%s314_s22] sm:$0xff]  ;;  %v372_v3 = vadd.f32 %v2006_v1, %v2004_v0  ;;  %v2012_v4 = vld [vmem:[%s314_s22 + $0x8] sm:$0xff]  ;;  %v389_v15 = vmax.f32 %v2004_v0, %v2006_v1  ;;  %1456 = vmatprep.subr.bf16.mxu0 %v1810_v17  ;;  %1462 = vmatprep.subr.bf16.mxu1 %v1810_v17  ;;  %vm421_vm2 = vcmask 1041409   ;;  %vm446_vm3 = vcmask 1043459  }
  0x5a   : > { %v2016_v6 = vld [vmem:[%s314_s22 + $0x38] sm:$0xff]  ;;  %v366_v7 = vadd.f32 %v2012_v4, %v2008_v2  ;;  %v2020_v8 = vld [vmem:[%s314_s22 + $0x10] sm:$0xff]  ;;  %v383_v13 = vmax.f32 %v2008_v2, %v2012_v4  ;;  %v1544_v16 = vld [vmem:[%s2169_s1] sm:$0xff]   ;;  %1458 = vmatprep.mubr.msk.bf16.mxu0 %vm1811_vm0, %v1810_v17  ;;  %1464 = vmatprep.mubr.msk.bf16.mxu1 %vm1811_vm0, %v1810_v17  ;;  %v400_v19 = vand.u32 127, %v399_v18  ;;  %v2039_v23 = vshrl.u32 %v399_v18, 7  ;;  %s1172_s15 = sld [smem:[#allocation2]] }
  0x5b   : > { %v2022_v9 = vld [vmem:[%s314_s22 + $0x18] sm:$0xff]  ;;  %373 = vadd.xlane.f32.xlu1 %v372_v3  ;;  %v375_v10 = vadd.f32 %v2016_v6, %v2014_v5  ;;  %v392_v14 = vmax.f32 %v2014_v5, %v2016_v6  ;;  %1457 = vmatpush3.bf16.msra.mxu0 %v1544_v16  ;;  %vm449_vm4 = vcmask 1041408   ;;  %vm467_vm5 = vcmask 130048   ;;  %v513_v52 = vld [vmem:[%s2171_s3] sm:$0x1]  ;;  %s1451_s11 = sshll.u32 %s1885_s7, 10 }
  0x5c   : > { %367 = vadd.xlane.f32.xlu0 %v366_v7  ;;  %v369_v11 = vadd.f32 %v2022_v9, %v2020_v8  ;;  %v386_v12 = vmax.f32 %v2020_v8, %v2022_v9  ;;  %v405_v22 = vadd.s32 4294967288, %v400_v19  ;;  %v403_v29 = vsub.s32 %v400_v19, %v2039_v23  ;;  %v1370_v54 = vld [vmem:[%s2170_s2] ss:$0 sm:$0xff]  ;;  %v1545_v62 = vld [vmem:[#allocation8 + $0x70] ss:$8 sps:$4 sm:$0xff]   ;;  %s354_s19 = scalar_lea.vmem [#allocation9], %s1366_s5  ;;  %s2120_s7 = scalar_lea.hbm %s2176_s8, %s1451_s11 }
  0x5d   : > { %vm525_vm6 = vcmask 1040384   ;;  %vm521_vm7 = vcmask 15360   ;;  %v1547_v63 = vld [vmem:[#allocation8 + $0x74] ss:$8 sps:$4 sm:$0xff]   ;;  %v1548_v3 = vld [vmem:[#allocation6 + $0x70] ss:$8 sps:$4 sm:$0xff]  }
  0x5e   : > { %v408_v26 = vsub.s32 %v405_v22, %v2039_v23  ;;  %v527_v53 = vsel %vm525_vm6, %v513_v52, 0  ;;  %v1550_v7 = vld [vmem:[#allocation6 + $0x74] ss:$8 sps:$4 sm:$0xff]   ;;  %916 = vmatprep.subr.bf16.mxu0 %v1547_v63  ;;  %v1557_v16 = vld [vmem:[#allocation8 + $0x50] ss:$8 sps:$4 sm:$0xff]   ;;  %s1264_s21 = sshll.u32 %s354_s19, 4  ;;  %s2122_s21 = int_to_ptr.vmem [resolvable:$true] %s1264_s21 }
  0x5f   : > { %376 = vadd.xlane.f32.xlu1 %v375_v10  ;;  %1463 = vmatpush3.bf16.msra.mxu1 %v527_v53  ;;  %v1553_v10 = vld [vmem:[#allocation8 + $0x64] ss:$8 sps:$4 sm:$0xff]   ;;  %v1560_v17 = vld [vmem:[#allocation6 + $0x50] ss:$8 sps:$4 sm:$0xff]   ;;  %v1571_v22 = vld [vmem:[#allocation8 + $0x34] ss:$8 sps:$4 sm:$0xff]  }
  0x60   : > { %370 = vadd.xlane.f32.xlu0 %v369_v11  ;;  %v1556_v11 = vld [vmem:[#allocation6 + $0x64] ss:$8 sps:$4 sm:$0xff]   ;;  %1131 = vmatprep.subr.bf16.mxu1 %v1550_v7  ;;  %v1598_v52 = vld [vmem:[#allocation6 + $0xf4] ss:$8 sps:$4 sm:$0xff]   ;;  %v1596_v53 = vld [vmem:[#allocation6 + $0xf0] ss:$8 sps:$4 sm:$0xff]  }
  0x61   : > { %v1565_v18 = vld [vmem:[#allocation8 + $0x44] ss:$8 sps:$4 sm:$0xff]   ;;  %v1608_v63 = vld [vmem:[#allocation6 + $0xd0] ss:$8 sps:$4 sm:$0xff]   ;;  %v2058_v7 = vsub.s32 1, %v2039_v23  ;;  %s1250_s5 = scalar_lea.sflag [#allocation5], %s1990_s20 }
  0x62   : > { %v1568_v19 = vld [vmem:[#allocation6 + $0x44] ss:$8 sps:$4 sm:$0xff]   ;;  %s1733_s14 = scalar_lea.vmem %s2122_s21, 1024  ;;  %p2194_p0 = scmp.ne.s32.totalorder %s2188_s16, 0 }
  0x63   : > { %387 = vmax.xlane.f32.xlu1 %v386_v12  ;;  %v1551_v12 = vld [vmem:[#allocation8 + $0x60] ss:$8 sps:$4 sm:$0xff]   ;;  %p1734_p10 = scmp.ne.s32.totalorder %s2122_s21, %s1733_s14  ;;  %s1813_s23 = smov [#allocation9]  }
  0x64   : > { %384 = vmax.xlane.f32.xlu0 %v383_v13  ;;  %v1554_v13 = vld [vmem:[#allocation6 + $0x60] ss:$8 sps:$4 sm:$0xff]   ;;  %s1737_s25 = sshll.u32 %s1813_s23, 4  ;;  %s1738_s25 = int_to_ptr.vmem [resolvable:$false] %s1737_s25 }
  0x65   : > { %p1735_p1 = pnand %p1734_p10, %p2194_p0  ;;  %s1739_s26 = scalar_lea.vmem %s1738_s25, 2048 }
  0x66   : > { %p1740_p6 = scmp.lt.s32.totalorder %s2122_s21, %s1738_s25  ;;  %p1741_p11 = scmp.lt.s32.totalorder %s1739_s26, %s1733_s14 }
  0x67   : > { %393 = vmax.xlane.f32.xlu1 %v392_v14  ;;  %v1559_v14 = vld [vmem:[#allocation8 + $0x54] ss:$8 sps:$4 sm:$0xff]   ;;  %p1736_p2 = pneg %p1735_p1 }
  0x68   : > { %390 = vmax.xlane.f32.xlu0 %v389_v15  ;;  %v1562_v15 = vld [vmem:[#allocation6 + $0x54] ss:$8 sps:$4 sm:$0xff]   ;;  %p1742_p7 = por %p1741_p11, %p1740_p6 }
  0x6a   : > { %p1743_p9 = pnand %p1742_p7, %p1736_p2 }
  0xe4   : > { %v374_v20 = vpop.xlane.xlu1 %373 }
  0xe5   : > { %v368_v21 = vpop.xlane.xlu0 %367  ;;  %v381_v30 = vmul.f32 0.00390625, %v374_v20  ;;  %v1563_v20 = vld [vmem:[#allocation8 + $0x40] ss:$8 sps:$4 sm:$0xff]  }
  0xe6   : > { %v379_v31 = vmul.f32 0.00390625, %v368_v21  ;;  %v1566_v21 = vld [vmem:[#allocation6 + $0x40] ss:$8 sps:$4 sm:$0xff]  }
  0xe7   : > { %v415_v36 = vrot.slane %v381_v30, %v403_v29  ;;  %v1578_v30 = vld [vmem:[#allocation6 + $0x20] ss:$8 sps:$4 sm:$0xff]  }
  0xe8   : > { %v377_v24 = vpop.xlane.xlu1 %376  ;;  %v404_v37 = vrot.slane %v379_v31, %v403_v29  ;;  %v1583_v31 = vld [vmem:[#allocation8 + $0x14] ss:$8 sps:$4 sm:$0xff]  }
  0xe9   : > { %v371_v25 = vpop.xlane.xlu0 %370  ;;  %v382_v27 = vmul.f32 0.00390625, %v377_v24  ;;  %v1574_v24 = vld [vmem:[#allocation6 + $0x34] ss:$8 sps:$4 sm:$0xff]  }
  0xea   : > { %v380_v28 = vmul.f32 0.00390625, %v371_v25  ;;  %v1569_v25 = vld [vmem:[#allocation8 + $0x30] ss:$8 sps:$4 sm:$0xff]  }
  0xeb   : > { %v419_v34 = vrot.slane %v382_v27, %v408_v26  ;;  %v1577_v27 = vld [vmem:[#allocation8 + $0x24] ss:$8 sps:$4 sm:$0xff]  }
  0xec   : > { %v388_v32 = vpop.xlane.xlu1 %387  ;;  %v409_v35 = vrot.slane %v380_v28, %v408_v26  ;;  %v1580_v28 = vld [vmem:[#allocation6 + $0x24] ss:$8 sps:$4 sm:$0xff]  }
  0xed   : > { %v385_v33 = vpop.xlane.xlu0 %384  ;;  %v435_v38 = vrot.slane %v388_v32, %v408_v26  ;;  %v420_v43 = vsel %vm410_vm1, %v419_v34, %v415_v36  ;;  %v1586_v32 = vld [vmem:[#allocation6 + $0x14] ss:$8 sps:$4 sm:$0xff]   ;;  %v1584_v34 = vld [vmem:[#allocation6 + $0x10] ss:$8 sps:$4 sm:$0xff]   ;;  %v1592_v36 = vld [vmem:[#allocation6 + $0x4] ss:$8 sps:$4 sm:$0xff]  }
  0xee   : > { %v431_v39 = vrot.slane %v385_v33, %v403_v29  ;;  %v411_v44 = vsel %vm410_vm1, %v409_v35, %v404_v37  ;;  %v1581_v33 = vld [vmem:[#allocation8 + $0x10] ss:$8 sps:$4 sm:$0xff]   ;;  %v1589_v35 = vld [vmem:[#allocation8 + $0x4] ss:$8 sps:$4 sm:$0xff]   ;;  %v1587_v37 = vld [vmem:[#allocation8] ss:$8 sps:$4 sm:$0xff]  }
  0xef   : > { %v422_v48 = vsel %vm421_vm2, %v420_v43, %v411_v44 }
  0xf0   : > { %v394_v40 = vpop.xlane.xlu1 %393  ;;  %v436_v46 = vsel %vm410_vm1, %v435_v38, %v431_v39  ;;  %v1590_v38 = vld [vmem:[#allocation6] ss:$8 sps:$4 sm:$0xff]  }
  0xf1   : > { %v444_v41 = vrot.slane %v394_v40, %v408_v26  ;;  %v391_v42 = vpop.xlane.xlu0 %390  ;;  %v1572_v26 = vld [vmem:[#allocation6 + $0x30] ss:$8 sps:$4 sm:$0xff]   ;;  %v1373_v39 = vld [vmem:[%s2172_s4] ss:$0 sm:$0xff] }
  0xf2   : > { %v440_v45 = vrot.slane %v391_v42, %v403_v29  ;;  %v1575_v29 = vld [vmem:[#allocation8 + $0x20] ss:$8 sps:$4 sm:$0xff]  }
  0xf4   : > { %v445_v47 = vsel %vm410_vm1, %v444_v41, %v440_v45 }
  0xf5   : > { %v447_v49 = vsel %vm446_vm3, %v445_v47, %v436_v46 }
  0xf6   : > { %v450_v50 = vsel %vm449_vm4, %v422_v48, %v447_v49 }
  0xf7   : > { %v451_v51 = vpack.c.bf16 %v450_v50, %v450_v50  ;;  %v1595_v50 = vld [vmem:[#allocation8 + $0xf4] ss:$8 sps:$4 sm:$0xff]  }
  0xf9   : > { %1459 = vmatmul.mubr.msk.bf16.vlgmr.msra.gmra.mxu0 %vm467_vm5, %v451_v51  ;;  %v1593_v51 = vld [vmem:[#allocation8 + $0xf0] ss:$8 sps:$4 sm:$0xff]  }
  0xfa   : > { %917 = vmatpush1.bf16.msra.mxu0 %v1545_v62 }
  0xfb   : > { %918 = vmatprep.subr.bf16.mxu0 %v1553_v10  ;;  %v1613_v10 = vld [vmem:[#allocation8 + $0xc4] ss:$8 sps:$4 sm:$0xff]  }
  0xfe   : > { %919 = vmatpush1.bf16.msra.mxu0 %v1551_v12  ;;  %v1616_v12 = vld [vmem:[#allocation6 + $0xc4] ss:$8 sps:$4 sm:$0xff]  }
  0xff   : > { %920 = vmatprep.subr.bf16.mxu0 %v1559_v14 }
 0x102   : > { %921 = vmatpush1.bf16.msra.mxu0 %v1557_v16  ;;  %v1617_v16 = vld [vmem:[#allocation8 + $0xb0] ss:$8 sps:$4 sm:$0xff]  }
 0x103   : > { %922 = vmatprep.subr.bf16.mxu0 %v1565_v18  ;;  %v1620_v18 = vld [vmem:[#allocation6 + $0xb0] ss:$8 sps:$4 sm:$0xff]  }
 0x106   : > { %923 = vmatpush1.bf16.msra.mxu0 %v1563_v20  ;;  %v1623_v20 = vld [vmem:[#allocation8 + $0xa0] ss:$8 sps:$4 sm:$0xff]  }
 0x107   : > { %924 = vmatprep.subr.bf16.mxu0 %v1571_v22  ;;  %v1626_v22 = vld [vmem:[#allocation6 + $0xa0] ss:$8 sps:$4 sm:$0xff]  }
 0x10a   : > { %925 = vmatpush1.bf16.msra.mxu0 %v1569_v25  ;;  %v1629_v25 = vld [vmem:[#allocation8 + $0x90] ss:$8 sps:$4 sm:$0xff]  }
 0x10b   : > { %926 = vmatprep.subr.bf16.mxu0 %v1577_v27  ;;  %v1632_v27 = vld [vmem:[#allocation6 + $0x90] ss:$8 sps:$4 sm:$0xff]  }
 0x10e   : > { %927 = vmatpush1.bf16.msra.mxu0 %v1575_v29  ;;  %v1637_v29 = vld [vmem:[#allocation8 + $0x84] ss:$8 sps:$4 sm:$0xff]  }
 0x10f   : > { %928 = vmatprep.subr.bf16.mxu0 %v1583_v31  ;;  %v1640_v31 = vld [vmem:[#allocation6 + $0x84] ss:$8 sps:$4 sm:$0xff]  }
 0x112   : > { %929 = vmatpush1.bf16.msra.mxu0 %v1581_v33 }
 0x113   : > { %930 = vmatprep.subr.bf16.mxu0 %v1589_v35 }
 0x116   : > { %931 = vmatpush1.bf16.msra.mxu0 %v1587_v37 }
 0x117   : > { %932 = vmatprep.subr.bf16.mxu0 %v1595_v50 }
 0x11a   : > { %933 = vmatpush2.bf16.msra.mxu0 %v1593_v51 }
 0x1b9   : > { %v505_v55 = vpop.f32.mrf.mxu0 }
 0x1ba   : > { %v506_v56 = vadd.f32 %v1370_v54, %v505_v55  ;;  %v1601_v54 = vld [vmem:[#allocation8 + $0xe4] ss:$8 sps:$4 sm:$0xff]   ;;  %v1599_v55 = vld [vmem:[#allocation8 + $0xe0] ss:$8 sps:$4 sm:$0xff]  }
 0x1bb   : > { %v1460_v57 = vpop.f32.mrf.mxu0  ;;  %934 = vmatprep.subr.bf16.mxu0 %v1601_v54 }
 0x1bc   : > { %v511_v58 = vmax.f32 %v506_v56, 0.0  ;;  %v1604_v56 = vld [vmem:[#allocation6 + $0xe4] ss:$8 sps:$4 sm:$0xff]   ;;  %935 = vmatpush2.bf16.msra.mxu0 %v1599_v55  ;;  %v1602_v57 = vld [vmem:[#allocation6 + $0xe0] ss:$8 sps:$4 sm:$0xff]  }
 0x1bd   : > { %v508_v59 = vpop.f32.mrf.mxu0 }
 0x1be   : > { %v512_v60 = vpack.c.bf16 %v511_v58, %v511_v58  ;;  %v2054_v58 = vsub.s32 0, %v2039_v23  ;;  %v1607_v59 = vld [vmem:[#allocation8 + $0xd4] ss:$8 sps:$4 sm:$0xff]  }
 0x1bf   : > { %v1461_v61 = vpop.f32.mrf.mxu0  ;;  %936 = vmatprep.subr.bf16.mxu0 %v1607_v59 }
 0x1c0   : > { %1465 = vmatmul.mubr.msk.bf16.vlgmr.msra.gmra.mxu1 %vm521_vm7, %v512_v60  ;;  %v1605_v60 = vld [vmem:[#allocation8 + $0xd0] ss:$8 sps:$4 sm:$0xff]   ;;  %v1610_v61 = vld [vmem:[#allocation6 + $0xd4] ss:$8 sps:$4 sm:$0xff]  }
 0x1c1   : > { %1132 = vmatpush1.bf16.msra.mxu1 %v1548_v3  ;;  %937 = vmatpush2.bf16.msra.mxu0 %v1605_v60 }
 0x1c2   : > { %1133 = vmatprep.subr.bf16.mxu1 %v1556_v11  ;;  %v1611_v11 = vld [vmem:[#allocation8 + $0xc0] ss:$8 sps:$4 sm:$0xff]   ;;  %938 = vmatprep.subr.bf16.mxu0 %v1613_v10 }
 0x1c5   : > { %1134 = vmatpush1.bf16.msra.mxu1 %v1554_v13  ;;  %v1614_v13 = vld [vmem:[#allocation6 + $0xc0] ss:$8 sps:$4 sm:$0xff]   ;;  %939 = vmatpush2.bf16.msra.mxu0 %v1611_v11 }
 0x1c6   : > { %1135 = vmatprep.subr.bf16.mxu1 %v1562_v15  ;;  %v1619_v15 = vld [vmem:[#allocation8 + $0xb4] ss:$8 sps:$4 sm:$0xff]  }
 0x1c7   : > { %940 = vmatprep.subr.bf16.mxu0 %v1619_v15 }
 0x1c9   : > { %1136 = vmatpush1.bf16.msra.mxu1 %v1560_v17  ;;  %v1622_v17 = vld [vmem:[#allocation6 + $0xb4] ss:$8 sps:$4 sm:$0xff]   ;;  %941 = vmatpush2.bf16.msra.mxu0 %v1617_v16 }
 0x1ca   : > { %1137 = vmatprep.subr.bf16.mxu1 %v1568_v19  ;;  %v1625_v19 = vld [vmem:[#allocation8 + $0xa4] ss:$8 sps:$4 sm:$0xff]  }
 0x1cb   : > { %942 = vmatprep.subr.bf16.mxu0 %v1625_v19 }
 0x1cd   : > { %1138 = vmatpush1.bf16.msra.mxu1 %v1566_v21  ;;  %v1628_v21 = vld [vmem:[#allocation6 + $0xa4] ss:$8 sps:$4 sm:$0xff]   ;;  %943 = vmatpush2.bf16.msra.mxu0 %v1623_v20 }
 0x1ce   : > { %1139 = vmatprep.subr.bf16.mxu1 %v1574_v24  ;;  %v1631_v24 = vld [vmem:[#allocation8 + $0x94] ss:$8 sps:$4 sm:$0xff]  }
 0x1cf   : > { %944 = vmatprep.subr.bf16.mxu0 %v1631_v24 }
 0x1d1   : > { %1140 = vmatpush1.bf16.msra.mxu1 %v1572_v26  ;;  %v1634_v26 = vld [vmem:[#allocation6 + $0x94] ss:$8 sps:$4 sm:$0xff]   ;;  %945 = vmatpush2.bf16.msra.mxu0 %v1629_v25 }
 0x1d2   : > { %1141 = vmatprep.subr.bf16.mxu1 %v1580_v28  ;;  %v1635_v28 = vld [vmem:[#allocation8 + $0x80] ss:$8 sps:$4 sm:$0xff]   ;;  %946 = vmatprep.subr.bf16.mxu0 %v1637_v29 }
 0x1d5   : > { %1142 = vmatpush1.bf16.msra.mxu1 %v1578_v30  ;;  %v1638_v30 = vld [vmem:[#allocation6 + $0x80] ss:$8 sps:$4 sm:$0xff]   ;;  %947 = vmatpush2.bf16.msra.mxu0 %v1635_v28 }
 0x1d6   : > { %1143 = vmatprep.subr.bf16.mxu1 %v1586_v32 }
 0x1d9   : > { %1144 = vmatpush1.bf16.msra.mxu1 %v1584_v34 }
 0x1da   : > { %1145 = vmatprep.subr.bf16.mxu1 %v1592_v36 }
 0x1dd   : > { %1146 = vmatpush1.bf16.msra.mxu1 %v1590_v38 }
 0x1de   : > { %1147 = vmatprep.subr.bf16.mxu1 %v1598_v52 }
 0x1e1   : > { %1148 = vmatpush2.bf16.msra.mxu1 %v1596_v53 }
 0x1e2   : > { %1149 = vmatprep.subr.bf16.mxu1 %v1604_v56 }
 0x1e5   : > { %1150 = vmatpush2.bf16.msra.mxu1 %v1602_v57 }
 0x1e6   : > { %1151 = vmatprep.subr.bf16.mxu1 %v1610_v61 }
 0x1e9   : > { %1152 = vmatpush2.bf16.msra.mxu1 %v1608_v63 }
 0x1ea   : > { %1153 = vmatprep.subr.bf16.mxu1 %v1616_v12 }
 0x1ed   : > { %1154 = vmatpush2.bf16.msra.mxu1 %v1614_v13 }
 0x1ee   : > { %1155 = vmatprep.subr.bf16.mxu1 %v1622_v17 }
 0x1f1   : > { %1156 = vmatpush2.bf16.msra.mxu1 %v1620_v18 }
 0x1f2   : > { %1157 = vmatprep.subr.bf16.mxu1 %v1628_v21 }
 0x1f5   : > { %1158 = vmatpush2.bf16.msra.mxu1 %v1626_v22 }
 0x1f6   : > { %1159 = vmatprep.subr.bf16.mxu1 %v1634_v26 }
 0x1f9   : > { %1160 = vmatpush2.bf16.msra.mxu1 %v1632_v27 }
 0x1fa   : > { %1161 = vmatprep.subr.bf16.mxu1 %v1640_v31 }
 0x1fd   : > { %1162 = vmatpush2.bf16.msra.mxu1 %v1638_v30 }
 0x280   : > { %v563_v40 = vpop.f32.mrf.mxu1 }
 0x281   : > { %v564_v41 = vadd.f32 %v1373_v39, %v563_v40 }
 0x282   : > { %v1466_v42 = vpop.f32.mrf.mxu1 }
 0x283   : > { %v570_v43 = vrot.slane %v564_v41, 2 }
 0x284   : > { %v566_v44 = vpop.f32.mrf.mxu1 }
 0x285   : > { %v572_v45 = vadd.f32 %v570_v43, %v564_v41 }
 0x286   : > { %v1467_v46 = vpop.f32.mrf.mxu1 }
 0x287   : > { %v1375_v47 = vmul.f32 -1.442695, %v572_v45 }
 0x289   : > { %1641 = vpow2.f32 %v1375_v47 }
 0x296   : > { %v1642_v48 = vpop.eup %1641 }
 0x297   : > { %v576_v49 = vadd.f32 1.0, %v1642_v48 }
 0x299   : > { %1643 = vrcp.f32 %v576_v49 }
 0x2a6   : > { %v1644_v62 = vpop.eup %1643 }
 0x2a7   : > { %v582_v3 = vrot.slane %v1644_v62, %v2054_v58  ;;  %v593_v14 = vrot.slane %v1644_v62, %v2058_v7 }
 0x2a9   : > { %588 = vbcast.lane.b32.xlu1 %v582_v3, 264  ;;  %584 = vbcast.lane.b32.xlu0 %v582_v3, 256 }
 0x2ad   : > { %595 = vbcast.lane.b32.xlu1 %v593_v14, 256 }
 0x2b1   : > { %599 = vbcast.lane.b32.xlu1 %v593_v14, 264 }
 0x31b   : > { %v589_v32 = vpop.permute.xlu1 %588  ;;  %v585_v33 = vpop.permute.xlu0 %584 }
 0x31c   : > { %v2062_v34 = vmul.f32 %v589_v32, %v2020_v8  ;;  %v2065_v35 = vmul.f32 %v589_v32, %v2022_v9  ;;  %v2068_v36 = vmul.f32 %v585_v33, %v2008_v2  ;;  %v2071_v37 = vmul.f32 %v585_v33, %v2012_v4 }
 0x31e   : > { %v609_v38 = vadd.f32 %v2062_v34, %v2068_v36  ;;  %v616_v39 = vadd.f32 %v2065_v35, %v2071_v37  ;;  %v642_v40 = vmax.f32 %v2068_v36, %v2062_v34  ;;  %v649_v8 = vmax.f32 %v2071_v37, %v2065_v35 }
 0x31f   : > { %v596_v9 = vpop.permute.xlu1 %595 }
 0x320   : > { %v610_v41 = vrot.slane %v609_v38, 4  ;;  %v617_v42 = vrot.slane %v616_v39, 4  ;;  %v643_v2 = vrot.slane %v642_v40, 4  ;;  %v650_v43 = vrot.slane %v649_v8, 4 }
 0x321   : > { %v2082_v52 = vmul.f32 %v596_v9, %v2004_v0  ;;  %v2085_v53 = vmul.f32 %v596_v9, %v2006_v1 }
 0x322   : > { %v611_v44 = vadd.f32 %v610_v41, %v609_v38  ;;  %v618_v4 = vadd.f32 %v617_v42, %v616_v39  ;;  %v644_v45 = vmax.f32 %v642_v40, %v643_v2  ;;  %v651_v46 = vmax.f32 %v649_v8, %v650_v43 }
 0x323   : > { %v600_v47 = vpop.permute.xlu1 %599 }
 0x324   : > { %v612_v48 = vrot.slane %v611_v44, 2  ;;  %v619_v49 = vrot.slane %v618_v4, 2  ;;  %v645_v50 = vrot.slane %v644_v45, 2  ;;  %v652_v51 = vrot.slane %v651_v46, 2 }
 0x325   : > { %v2088_v54 = vmul.f32 %v600_v47, %v2014_v5  ;;  %v2091_v55 = vmul.f32 %v600_v47, %v2016_v6 }
 0x326   : > { %v613_v56 = vadd.f32 %v612_v48, %v611_v44  ;;  %v620_v57 = vadd.f32 %v619_v49, %v618_v4  ;;  %v646_v59 = vmax.f32 %v644_v45, %v645_v50  ;;  %v653_v60 = vmax.f32 %v651_v46, %v652_v51 }
 0x327   : > { %v623_v61 = vadd.f32 %v2088_v54, %v2082_v52  ;;  %v630_v0 = vadd.f32 %v2091_v55, %v2085_v53  ;;  %v656_v1 = vmax.f32 %v2082_v52, %v2088_v54  ;;  %v663_v5 = vmax.f32 %v2085_v53, %v2091_v55 }
 0x328   : > { %v614_v62 = vrot.slane %v613_v56, 1  ;;  %v621_v63 = vrot.slane %v620_v57, 1  ;;  %v647_v12 = vrot.slane %v646_v59, 1  ;;  %v654_v13 = vrot.slane %v653_v60, 1 }
 0x329   : > { %v624_v6 = vrot.slane %v623_v61, 4  ;;  %v631_v3 = vrot.slane %v630_v0, 4  ;;  %v657_v10 = vrot.slane %v656_v1, 4  ;;  %v664_v11 = vrot.slane %v663_v5, 4 }
 0x32a   : > { %v615_v18 = vadd.f32 %v614_v62, %v613_v56  ;;  %v622_v19 = vadd.f32 %v621_v63, %v620_v57  ;;  %v648_v25 = vmax.f32 %v646_v59, %v647_v12  ;;  %v655_v26 = vmax.f32 %v653_v60, %v654_v13 }
 0x32b   : > { %v625_v14 = vadd.f32 %v624_v6, %v623_v61  ;;  %v632_v15 = vadd.f32 %v631_v3, %v630_v0  ;;  %v658_v16 = vmax.f32 %v656_v1, %v657_v10  ;;  %v665_v17 = vmax.f32 %v663_v5, %v664_v11 }
 0x32c   : > { %v638_v31 = vmul.f32 0.0625, %v615_v18  ;;  %v639_v32 = vmul.f32 0.0625, %v622_v19  ;;  %v706_v8 = vpack.c.bf16 %v648_v25, %v648_v25  ;;  %v707_v9 = vpack.c.bf16 %v655_v26, %v655_v26 }
 0x32d   : > { %v626_v20 = vrot.slane %v625_v14, 2  ;;  %v633_v21 = vrot.slane %v632_v15, 2  ;;  %v659_v22 = vrot.slane %v658_v16, 2  ;;  %v666_v24 = vrot.slane %v665_v17, 2 }
 0x32e   : > { %v670_v44 = vpack.c.bf16 %v638_v31, %v638_v31  ;;  %v671_v4 = vpack.c.bf16 %v639_v32, %v639_v32  ;;  %v746_v49 = vunpack.c.l.b16 %v706_v8  ;;  %v747_v50 = vunpack.c.l.b16 %v707_v9 }
 0x32f   : > { %v627_v27 = vadd.f32 %v626_v20, %v625_v14  ;;  %v634_v28 = vadd.f32 %v633_v21, %v632_v15  ;;  %v660_v29 = vmax.f32 %v658_v16, %v659_v22  ;;  %v667_v30 = vmax.f32 %v665_v17, %v666_v24 }
 0x330   : > { %v962_v60 = vunpack.c.l.b16 %v671_v4  ;;  %v961_v61 = vunpack.c.l.b16 %v670_v44  ;;  %v1173_v16 = vstv %s1172_s15 }
 0x331   : > { %v628_v33 = vrot.slane %v627_v27, 1  ;;  %v635_v38 = vrot.slane %v634_v28, 1  ;;  %v661_v39 = vrot.slane %v660_v29, 1  ;;  %v668_v40 = vrot.slane %v667_v30, 1 }
 0x333   : > { %v629_v41 = vadd.f32 %v628_v33, %v627_v27  ;;  %v662_v42 = vmax.f32 %v660_v29, %v661_v39  ;;  %v669_v2 = vmax.f32 %v667_v30, %v668_v40  ;;  %v636_v43 = vadd.f32 %v635_v38, %v634_v28 }
 0x334   : > { %v1812_v33 = vmov 1966171168  }
 0x335   : > { %v640_v45 = vmul.f32 0.0625, %v629_v41  ;;  %v708_v46 = vpack.c.bf16 %v662_v42, %v662_v42  ;;  %v709_v47 = vpack.c.bf16 %v669_v2, %v669_v2  ;;  %v641_v48 = vmul.f32 0.0625, %v636_v43 }
 0x336   : > { %v1192_v38 = vunpack.c.l.s4 %v1812_v33 }
 0x337   : > { %v672_v51 = vpack.c.bf16 %v640_v45, %v640_v45  ;;  %v748_v56 = vunpack.c.l.b16 %v708_v46  ;;  %v749_v57 = vunpack.c.l.b16 %v709_v47  ;;  %v673_v59 = vpack.c.bf16 %v641_v48, %v641_v48 }
 0x338   : > { %v1193_v39 = vunpack.c.0.s8 %v1192_v38 }
 0x339   : > { %v751_v0 = vsel %vm421_vm2, %v749_v57, %v747_v50  ;;  %v750_v1 = vsel %vm421_vm2, %v748_v56, %v746_v49  ;;  %v964_v5 = vunpack.c.l.b16 %v673_v59  ;;  %v963_v62 = vunpack.c.l.b16 %v672_v51 }
 0x33a   : > { %v753_v63 = vpack.c.b16 %v751_v0, %v751_v0  ;;  %v752_v6 = vpack.c.b16 %v750_v1, %v750_v1  ;;  %v1196_v8 = vsub.s32 %v1193_v39, %v2039_v23 }
 0x33b   : > { %v966_v3 = vsel %vm421_vm2, %v964_v5, %v962_v60  ;;  %v965_v10 = vsel %vm421_vm2, %v963_v62, %v961_v61 }
 0x33c   : > { %948 = vmatprep.mubr.bf16.mxu0 %v753_v63  ;;  %v968_v11 = vpack.c.b16 %v966_v3, %v966_v3  ;;  %v967_v12 = vpack.c.b16 %v965_v10, %v965_v10 }
 0x33d   : > { %949 = vmatmul.mubr.bf16.vlgmr.msra.gmra.mxu0 %v752_v6 }
 0x33e   : > { %1163 = vmatprep.mubr.bf16.mxu1 %v968_v11 }
 0x33f   : > { %1164 = vmatmul.mubr.bf16.vlgmr.msra.gmra.mxu1 %v967_v12 }
 0x3fd   : > { %v950_v13 = vpop.f32.mrf.mxu0 }
 0x3ff   : > { %v952_v14 = vpop.f32.mrf.mxu0  ;;  %v1165_v15 = vpop.f32.mrf.mxu1 }
 0x400   : > { %v1166_v17 = vadd.f32 %v1165_v15, %v950_v13 }
 0x401   : > { %v954_v18 = vpop.f32.mrf.mxu0  ;;  %v1167_v19 = vpop.f32.mrf.mxu1 }
 0x402   : > { %v1174_v20 = vadd.f32 %v1173_v16, %v1166_v17  ;;  %v1168_v21 = vadd.f32 %v1167_v19, %v952_v14 }
 0x403   : > { %v955_v22 = vpop.f32.mrf.mxu0  ;;  %v1169_v24 = vpop.f32.mrf.mxu1 }
 0x404   : > { %v1440_v25 = vmul.f32 -1.442695, %v1174_v20  ;;  %v1175_v26 = vadd.f32 %v1173_v16, %v1168_v21 }
 0x405   : > { %v1170_v27 = vpop.f32.mrf.mxu1 }
 0x406   : > { %1645 = vpow2.f32 %v1440_v25  ;;  %v1441_v28 = vmul.f32 -1.442695, %v1175_v26 }
 0x408   : > { %1647 = vpow2.f32 %v1441_v28 }
 0x413   : > { %v1646_v29 = vpop.eup %1645 }
 0x414   : > { %v1182_v30 = vadd.f32 1.0, %v1646_v29 }
 0x415   : > { %v1648_v31 = vpop.eup %1647 }
 0x416   : > { %v1183_v32 = vadd.f32 1.0, %v1648_v31  ;;  %1649 = vrcp.f32 %v1182_v30 }
 0x418   : > { %1651 = vrcp.f32 %v1183_v32 }
 0x423   : > { %v1650_v40 = vpop.eup %1649 }
 0x425   : > { %v1652_v9 = vpop.eup %1651 }
 0x426   : > { %v1190_v41 = vcombine.low %v1650_v40, %v1652_v9 }
 0x428   : > { %v1197_v42 = vrot.slane %v1190_v41, %v1196_v8 }
 0x42a   : > { %v1198_v2 = vcombine.high %v1197_v42, %v1197_v42  ;;  %v1205_v43 = vrot.slane %v1197_v42, %v1196_v8 }
 0x42c   : > { %v1212_v44 = vrot.slane %v1198_v2, %v1196_v8  ;;  %v1216_v4 = vrot.slane %v1205_v43, %v2054_v58  ;;  %v1220_v45 = vrot.slane %v1205_v43, %v2058_v7 }
 0x42e   : > { %v1224_v46 = vrot.slane %v1212_v44, %v2054_v58  ;;  %v1228_v47 = vrot.slane %v1212_v44, %v2058_v7  ;;  %v1233_v23 = vmul.f32 %v1216_v4, %v2068_v36  ;;  %v1234_v48 = vmul.f32 %v1220_v45, %v2071_v37 }
 0x42f   : > { %v1235_v49 = vmul.f32 %v1216_v4, %v2062_v34  ;;  %v1236_v50 = vmul.f32 %v1220_v45, %v2065_v35 }
 0x430   : > { %v1237_v58 = vmul.f32 %v1224_v46, %v2082_v52  ;;  %v1238_v7 = vmul.f32 %v1228_v47, %v2085_v53  ;;  %v1239_v36 = vmul.f32 %v1224_v46, %v2088_v54  ;;  %v1240_v34 = vmul.f32 %v1228_v47, %v2091_v55  ;;  %1241 = vst [vmem:[%s354_s19] sm:$0xff] %v1233_v23 }
 0x431   : > { %1242 = vst [vmem:[%s354_s19 + $0x8] sm:$0xff] %v1234_v48  ;;  %1243 = vst [vmem:[%s354_s19 + $0x10] sm:$0xff] %v1235_v49 }
 0x432   : > { %1244 = vst [vmem:[%s354_s19 + $0x18] sm:$0xff] %v1236_v50  ;;  %1245 = vst [vmem:[%s354_s19 + $0x20] sm:$0xff] %v1237_v58 }
 0x433   : > { %1246 = vst [vmem:[%s354_s19 + $0x28] sm:$0xff] %v1238_v7  ;;  %1247 = vst [vmem:[%s354_s19 + $0x30] sm:$0xff] %v1239_v36 }
 0x434   : > { %1248 = vst [vmem:[%s354_s19 + $0x38] sm:$0xff] %v1240_v34 }
 0x435   : > { %1746 = shalt.err (!%p1743_p9)
}
 0x436   : > { %s1747_s27 = scalar_lea.hbm %s2120_s7, 1024  ;;  %s1751_s15 = scalar_lea.hbm %s2176_s8, 4096 }
 0x437   : > { %p1748_p12 = scmp.ne.s32.totalorder %s2120_s7, %s1747_s27  ;;  %p1752_p4 = scmp.lt.s32.totalorder %s2120_s7, %s2176_s8 }
 0x438   : > { %p1753_p8 = scmp.lt.s32.totalorder %s1751_s15, %s1747_s27 }
 0x439   : > { %p1749_p3 = pnand %p1748_p12, %p2194_p0 }
 0x43a   : > { %p1754_p5 = por %p1753_p8, %p1752_p4 }
 0x43b   : > { %p1750_p13 = pneg %p1749_p3 }
 0x43d   : > { %p1755_p10 = pnand %p1754_p5, %p1750_p13 }
 0x43f   : > { %1758 = shalt.err (!%p1755_p10)
}
 0x440   : > { %s1814_s22 = smov 256   ;;  %s1815_s12 = smov 16  }
 0x441   : > { %1478 = dma.vmem_to_hbm [thread:$0]  (%p2194_p0), %s2122_s21, 1024, %s2120_s7, %s1250_s5, %s1814_s22, %s1814_s22, %s1815_s12  }
 0x442 PF: > { %p1500_p1 = scmp.ge.s32.totalorder %s1801_s10, 2  ;;  %s1279_s14 = sand.u32 1, %s1789_s29  }
 0x443   : > { %p2195_p2 = scmp.ne.s32.totalorder %s2183_s13, 0  ;;  %s1280_s23 = scalar_lea.sflag [#allocation5], %s1279_s14 }
 0x445   : > { %p1492_p6 = pnand %p1500_p1, %p2195_p2 }
 0x447   : > { %p1493_p11 = pneg %p1492_p6 }
 0x449   : > { %1784 = dma.done.wait (%p1493_p11), %s1280_s23, 1024  }
 0x44a   : > { %1786 = vsyncadd (%p1493_p11), %s1280_s23, 4294966272  ;;  %p23_p7 = scmp.ge.s32.totalorder %s1935_s28, 6   ;;  %s2196_s29 = smov %s1793_s30 }
 0x44b   : > { %s2197_s30 = smov %s1797_s9  ;;  %s2198_s9 = smov %s1951_s17 }
 0x44c   : > { %s2199_s10 = smov %s1935_s28  ;;  %25 = sbr.rel (!%p23_p7) target bundleno = 9 (0x9), region = 105 }
 0x451   :  { %1285 = vsyncpa [#allocation4], 1 }
 0x452   :  { %1287 = vsyncpa [#allocation4 + $0x1], 1 }
 0x453   :  { %1288 = vsyncpa [#allocation7], 1 }
 0x454   :  { %1289 = vsyncpa [#allocation5], 1 }
 0x455   :  { %1291 = vsyncpa [#allocation5 + $0x1], 1 }

</bundles_post_ra>
